<compile_context>
chip_gen: v6e
topology: v6e:2x2x1
jax: 0.10.0
libtpu: 0.0.40
codegen_flags: <defaults>
</compile_context>

<pallas_src>
import functools

import jax
import jax.numpy as jnp
from jax.experimental import pallas as pl
from jax.experimental.pallas import tpu as pltpu

# ----------------------------- configuration ------------------------------ #
B, C_IN, H, W = 2, 3, 16, 16          # small NCHW input
C_MID = 16                            # backbone output channels
NA, NC = 3, 4                         # num anchors, num classes
NO = NC + 5                           # outputs per anchor (x,y,w,h,obj,cls..)
C_DET = NA * NO                       # detect-head channels = 27
C_PAD = 32                            # detect channels padded to sublane mult.
K_RAW = C_IN * 9                      # 27 im2col rows
K_PAD = 32                            # 27 + ones-row (BN shift) + zero pad
STRIDE = 8.0                          # detect-layer stride constant
ANCHORS = jnp.array([[10.0, 13.0], [16.0, 30.0], [33.0, 23.0]],
                    dtype=jnp.float32)
BN_EPS = 1e-5

M = B * H * W                         # 512: lane-dense row dim, multiple of 256
TILE_M = M                            # single grid step (whole problem in VMEM)


# ------------------------------ Pallas kernel ------------------------------ #
def fused_forward_kernel(p_ref, w1_ref, w2_ref, const_ref, o_ref, *,
                         stride, height, width, w_shift, tile_m):
    """Backbone Conv3x3+BN+SiLU, Detect 1x1 conv+sigmoid, YOLO decode — fused.

    p_ref:     (K_PAD, tile_m)  bf16 im2col patches (+ ones row for BN shift)
    w1_ref:    (C_MID, K_PAD)   bf16 conv weight, BN scale folded, shift in col 27
    w2_ref:    (C_PAD, C_MID)   bf16 detect 1x1 weight (rows >= C_DET are zero)
    const_ref: (C_PAD, 8)       f32  cols = [b2, c1, c2, mx, my, 0, 0, 0]
    o_ref:     (C_PAD, tile_m)  f32  decoded predictions (lane-dense last dim)
    """
    # Backbone: conv3x3 as im2col matmul (bf16 operands, f32 accumulate).
    # BN scale/shift are folded into w1 / the ones-row -> no VPU bias add.
    z = jnp.dot(w1_ref[...], p_ref[...], preferred_element_type=jnp.float32)
    feat = z * jax.nn.sigmoid(z)          # SiLU in f32 (v5e: no bf16 VPU/EUP)

    # Detect head: 1x1 conv + bias + sigmoid (feat never leaves VMEM/vregs).
    logits = jnp.dot(w2_ref[...], feat.astype(jnp.bfloat16),
                     preferred_element_type=jnp.float32)
    y = jax.nn.sigmoid(logits + const_ref[:, 0:1])

    # YOLO decode as per-channel polynomial: out = (c2*y + c1)*y + c0,
    # c0 = mx*gx + my*gy.  Row index r = h*W + w repeats every H*W rows and
    # TILE_M % (H*W) == 0, so no program_id term is needed; H/W are powers of
    # two so div/mod become shift/mask (cheap VPU ops, no DMA'd grid tensor).
    r = jax.lax.broadcasted_iota(jnp.int32, (1, tile_m), 1)
    gx = ((r & (width - 1)).astype(jnp.float32) - 0.5) * stride
    gy = (((r >> w_shift) & (height - 1)).astype(jnp.float32) - 0.5) * stride
    c1 = const_ref[:, 1:2]
    c2 = const_ref[:, 2:3]
    c0 = const_ref[:, 3:4] * gx + const_ref[:, 4:5] * gy     # (C_PAD, tile_m)
    o_ref[...] = (c2 * y + c1) * y + c0


# ------------------------------ glue / wrapper ----------------------------- #
def _im2col_patches(x):
    """(B, 3, H, W) f32 -> (K_PAD, M) bf16 patches, rows ordered (c_in, kh, kw).

    Built from pad + static slices + concat (no conv dispatch), so the ordering
    is unambiguous by construction and XLA can fuse the whole producer into the
    Pallas input DMA (allow_input_fusion).
    """
    xpad = jnp.pad(x, ((0, 0), (0, 0), (1, 1), (1, 1)))
    rows = []
    for ci in range(C_IN):
        for kh in range(3):
            for kw in range(3):
                rows.append(xpad[:, ci, kh:kh + H, kw:kw + W].reshape(1, M))
    rows.append(jnp.ones((1, M), x.dtype))                    # ones row (BN shift)
    rows.append(jnp.zeros((K_PAD - K_RAW - 1, M), x.dtype))   # pad K: 28 -> 32
    return jnp.concatenate(rows, axis=0).astype(jnp.bfloat16)


def traced_model_forward(x, params):
    """out = detect(backbone(x)); x: (B, 3, H, W) f32 NCHW.

    Returns (B, NA*H*W, NO) decoded predictions.
    """
    assert M % TILE_M == 0 and TILE_M % (H * W) == 0
    assert H & (H - 1) == 0 and W & (W - 1) == 0
    assert TILE_M % 256 == 0          # full MXU output width on v6e/v7x

    patches = _im2col_patches(x)

    raw = pl.pallas_call(
        functools.partial(fused_forward_kernel, stride=STRIDE, height=H,
                          width=W, w_shift=(W - 1).bit_length(), tile_m=TILE_M),
        out_shape=jax.ShapeDtypeStruct((C_PAD, M), jnp.float32),
        grid=(M // TILE_M,),          # == (1,): no per-step pipeline overhead
        in_specs=[pl.BlockSpec((K_PAD, TILE_M), lambda i: (0, i)),
                  pl.BlockSpec((C_MID, K_PAD), lambda i: (0, 0)),
                  pl.BlockSpec((C_PAD, C_MID), lambda i: (0, 0)),
                  pl.BlockSpec((C_PAD, 8), lambda i: (0, 0))],
        out_specs=pl.BlockSpec((C_PAD, TILE_M), lambda i: (0, i)),
        compiler_params=pltpu.CompilerParams(
            # Single-step grid: nothing to shard across v7x's 2 TCs at this
            # size; if B/H/W grow, re-tile so the grid has >=2 steps and mark
            # this axis "parallel".
            dimension_semantics=("arbitrary",),
            allow_input_fusion=[True, False, False, False]),
    )(patches, params["w1_aug"], params["w2_pad"], params["const"])

    # (C_PAD, M) -> drop pad rows -> (B, NA, H, W, NO) -> (B, NA*H*W, NO).
    # The final layout is lane-sparse (NO=9), so this tiny permute is cheaper
    # as one XLA op than as an in-kernel masked store.
    out = raw[:C_DET].reshape(NA, NO, B, H, W)
    out = jnp.transpose(out, (2, 0, 3, 4, 1))
    return out.reshape(B, NA * H * W, NO)


def make_params(key):
    k = jax.random.split(key, 8)
    # Backbone conv (PyTorch OIHW) and inference BatchNorm.
    w1 = jax.random.normal(k[0], (C_MID, C_IN, 3, 3), jnp.float32) * 0.1
    gamma = 1.0 + 0.1 * jax.random.normal(k[1], (C_MID,), jnp.float32)
    beta = 0.1 * jax.random.normal(k[2], (C_MID,), jnp.float32)
    rmean = 0.1 * jax.random.normal(k[3], (C_MID,), jnp.float32)
    rvar = jnp.abs(jax.random.normal(k[4], (C_MID,), jnp.float32)) + 1.0
    # Detect 1x1 conv.
    w2 = jax.random.normal(k[5], (C_DET, C_MID, 1, 1), jnp.float32) * 0.1
    b2 = 0.1 * jax.random.normal(k[6], (C_DET,), jnp.float32)

    bn_scale = gamma / jnp.sqrt(rvar + BN_EPS)
    bn_shift = beta - rmean * bn_scale

    # w1 with BN scale folded into the 27 im2col columns, BN shift in the
    # ones-row column, zero-padded K -> 32, bf16 for MXU-native matmul.
    w1_aug = jnp.zeros((C_MID, K_PAD), jnp.float32)
    w1_aug = w1_aug.at[:, :K_RAW].set(w1.reshape(C_MID, K_RAW) * bn_scale[:, None])
    w1_aug = w1_aug.at[:, K_RAW].set(bn_shift)
    w1_aug = w1_aug.astype(jnp.bfloat16)

    # Detect weight padded to 32 output channels (extra rows zero).
    w2_pad = jnp.zeros((C_PAD, C_MID), jnp.float32)
    w2_pad = w2_pad.at[:C_DET].set(w2.reshape(C_DET, C_MID))
    w2_pad = w2_pad.astype(jnp.bfloat16)

    # Per-channel polynomial decode constants (channel c = a*NO + within):
    #   x/y : out = 2*stride*y + (grid - 0.5)*stride  -> c1 = 2*stride, c2 = 0
    #   w/h : out = 4*anchor*y^2                      -> c1 = 0, c2 = 4*anchor
    #   rest: out = y                                 -> c1 = 1, c2 = 0
    ch = jnp.arange(C_DET)
    within, a_idx = ch % NO, ch // NO
    is_x, is_y = within == 0, within == 1
    is_w, is_h = within == 2, within == 3
    c1 = jnp.where(is_x | is_y, 2.0 * STRIDE,
                   jnp.where(is_w | is_h, 0.0, 1.0))
    c2 = jnp.where(is_w, 4.0 * ANCHORS[a_idx, 0],
                   jnp.where(is_h, 4.0 * ANCHORS[a_idx, 1], 0.0))
    const = jnp.zeros((C_PAD, 8), jnp.float32)
    const = const.at[:C_DET, 0].set(b2)
    const = const.at[:C_DET, 1].set(c1)
    const = const.at[:C_DET, 2].set(c2)
    const = const.at[:C_DET, 3].set(is_x.astype(jnp.float32))
    const = const.at[:C_DET, 4].set(is_y.astype(jnp.float32))

    packed = dict(w1_aug=w1_aug, w2_pad=w2_pad, const=const)
    raw = dict(w1=w1, gamma=gamma, beta=beta, rmean=rmean, rvar=rvar,
               w2=w2, b2=b2)
    return packed, raw


def reference_forward(x, raw):
    """Independent pure-JAX f32 reference (conv ops) mirroring the PyTorch module."""
    z = jax.lax.conv_general_dilated(
        x, raw["w1"], (1, 1), "SAME",
        dimension_numbers=("NCHW", "OIHW", "NCHW"))
    scale = raw["gamma"] / jnp.sqrt(raw["rvar"] + BN_EPS)
    shift = raw["beta"] - raw["rmean"] * scale
    z = z * scale[None, :, None, None] + shift[None, :, None, None]
    feat = z * jax.nn.sigmoid(z)                               # SiLU
    logits = jax.lax.conv_general_dilated(
        feat, raw["w2"], (1, 1), "SAME",
        dimension_numbers=("NCHW", "OIHW", "NCHW"))
    logits = logits + raw["b2"][None, :, None, None]
    y = jax.nn.sigmoid(logits)                                 # (B, C_DET, H, W)
    y = y.reshape(B, NA, NO, H, W).transpose(0, 1, 3, 4, 2)    # (B, NA, H, W, NO)
    gx = jnp.arange(W, dtype=jnp.float32)[None, :]
    gy = jnp.arange(H, dtype=jnp.float32)[:, None]
    px = (y[..., 0] * 2.0 - 0.5 + gx) * STRIDE
    py = (y[..., 1] * 2.0 - 0.5 + gy) * STRIDE
    pw = (y[..., 2] * 2.0) ** 2 * ANCHORS[:, 0][None, :, None, None]
    ph = (y[..., 3] * 2.0) ** 2 * ANCHORS[:, 1][None, :, None, None]
    out = jnp.concatenate(
        [px[..., None], py[..., None], pw[..., None], ph[..., None], y[..., 4:]],
        axis=-1)
    return out.reshape(B, NA * H * W, NO)


if __name__ == "__main__":
    key = jax.random.PRNGKey(0)
    kx, kp = jax.random.split(key)
    x = jax.random.uniform(kx, (B, C_IN, H, W), jnp.float32)   # NCHW like torch
    params, raw_params = make_params(kp)

    fwd = jax.jit(traced_model_forward)
    out = jax.block_until_ready(fwd(x, params))
    assert out.shape == (B, NA * H * W, NO), out.shape
    assert bool(jnp.all(jnp.isfinite(out)))

    # Correctness vs an independent f32 conv-based reference (loose tolerance:
    # the kernel matmul operands are bf16).
    ref = reference_forward(x, raw_params)
    assert bool(jnp.allclose(out, ref, atol=0.3, rtol=0.05)), (
        float(jnp.max(jnp.abs(out - ref))))
    print("KERNEL_OK")
</pallas_src>

<mosaic_0001>
module attributes {stable_mosaic.version = 11 : i64} {
  func.func @fused_forward_kernel(%arg0: i32, %arg1: memref<32x512xbf16, #tpu.memory_space<vmem>>, %arg2: memref<16x32xbf16, #tpu.memory_space<vmem>>, %arg3: memref<32x16xbf16, #tpu.memory_space<vmem>>, %arg4: memref<32x8xf32, #tpu.memory_space<vmem>>, %arg5: memref<32x512xf32, #tpu.memory_space<vmem>>) attributes {dimension_semantics = [#tpu.dimension_semantics<arbitrary>], iteration_bounds = array<i64: 1>, scalar_prefetch = 0 : i64, scratch_operands = 0 : i64, tpu.core_type = #tpu.core_type<tc>, window_params = [{transform_indices = @transform_0, window_bounds = array<i64: 32, 512>}, {pipeline_mode = #tpu.pipeline_mode<synchronous>, transform_indices = @transform_1, window_bounds = array<i64: 16, 32>}, {pipeline_mode = #tpu.pipeline_mode<synchronous>, transform_indices = @transform_2, window_bounds = array<i64: 32, 16>}, {pipeline_mode = #tpu.pipeline_mode<synchronous>, transform_indices = @transform_3, window_bounds = array<i64: 32, 8>}, {transform_indices = @transform_4, window_bounds = array<i64: 32, 512>}]} {
    %c0 = arith.constant 0 : index
    %c0_0 = arith.constant 0 : index
    %0 = vector.load %arg2[%c0, %c0_0] : memref<16x32xbf16, #tpu.memory_space<vmem>>, vector<16x32xbf16>
    %c0_1 = arith.constant 0 : index
    %c0_2 = arith.constant 0 : index
    %1 = vector.load %arg1[%c0_1, %c0_2] : memref<32x512xbf16, #tpu.memory_space<vmem>>, vector<32x512xbf16>
    %cst = arith.constant dense<0.000000e+00> : vector<16x512xf32>
    %2 = tpu.matmul %0, %1, %cst {dimension_numbers = #tpu.dot_dimension_numbers<[1], [0], [0], [1], [0, 0, 1, 1], [], []>} : vector<16x32xbf16>, vector<32x512xbf16>, vector<16x512xf32> -> vector<16x512xf32>
    %3 = arith.negf %2 : vector<16x512xf32>
    %4 = math.exp %3 : vector<16x512xf32>
    %cst_3 = arith.constant 1.000000e+00 : f32
    %5 = vector.broadcast %cst_3 : f32 to vector<16x512xf32>
    %6 = arith.addf %5, %4 : vector<16x512xf32>
    %7 = arith.divf %5, %6 : vector<16x512xf32>
    %8 = arith.mulf %2, %7 : vector<16x512xf32>
    %c0_4 = arith.constant 0 : index
    %c0_5 = arith.constant 0 : index
    %9 = vector.load %arg3[%c0_4, %c0_5] : memref<32x16xbf16, #tpu.memory_space<vmem>>, vector<32x16xbf16>
    %10 = arith.truncf %8 : vector<16x512xf32> to vector<16x512xbf16>
    %cst_6 = arith.constant dense<0.000000e+00> : vector<32x512xf32>
    %11 = tpu.matmul %9, %10, %cst_6 {dimension_numbers = #tpu.dot_dimension_numbers<[1], [0], [0], [1], [0, 0, 1, 1], [], []>} : vector<32x16xbf16>, vector<16x512xbf16>, vector<32x512xf32> -> vector<32x512xf32>
    %c0_7 = arith.constant 0 : index
    %c0_8 = arith.constant 0 : index
    %12 = vector.load %arg4[%c0_7, %c0_8] : memref<32x8xf32, #tpu.memory_space<vmem>>, vector<32x1xf32>
    %13 = vector.broadcast %12 : vector<32x1xf32> to vector<32x512xf32>
    %14 = arith.addf %11, %13 : vector<32x512xf32>
    %15 = arith.negf %14 : vector<32x512xf32>
    %16 = math.exp %15 : vector<32x512xf32>
    %cst_9 = arith.constant 1.000000e+00 : f32
    %17 = vector.broadcast %cst_9 : f32 to vector<32x512xf32>
    %18 = arith.addf %17, %16 : vector<32x512xf32>
    %19 = arith.divf %17, %18 : vector<32x512xf32>
    %20 = tpu.iota {dimensions = array<i32: 1>} : vector<1x512xi32>
    %c15_i32 = arith.constant 15 : i32
    %21 = vector.broadcast %c15_i32 : i32 to vector<1x512xi32>
    %22 = arith.andi %20, %21 : vector<1x512xi32>
    %23 = arith.sitofp %22 : vector<1x512xi32> to vector<1x512xf32>
    %cst_10 = arith.constant 5.000000e-01 : f32
    %24 = vector.broadcast %cst_10 : f32 to vector<1x512xf32>
    %25 = arith.subf %23, %24 : vector<1x512xf32>
    %cst_11 = arith.constant 8.000000e+00 : f32
    %26 = vector.broadcast %cst_11 : f32 to vector<1x512xf32>
    %27 = arith.mulf %25, %26 : vector<1x512xf32>
    %c4_i32 = arith.constant 4 : i32
    %28 = vector.broadcast %c4_i32 : i32 to vector<1x512xi32>
    %29 = arith.shrsi %20, %28 : vector<1x512xi32>
    %c15_i32_12 = arith.constant 15 : i32
    %30 = vector.broadcast %c15_i32_12 : i32 to vector<1x512xi32>
    %31 = arith.andi %29, %30 : vector<1x512xi32>
    %32 = arith.sitofp %31 : vector<1x512xi32> to vector<1x512xf32>
    %cst_13 = arith.constant 5.000000e-01 : f32
    %33 = vector.broadcast %cst_13 : f32 to vector<1x512xf32>
    %34 = arith.subf %32, %33 : vector<1x512xf32>
    %cst_14 = arith.constant 8.000000e+00 : f32
    %35 = vector.broadcast %cst_14 : f32 to vector<1x512xf32>
    %36 = arith.mulf %34, %35 : vector<1x512xf32>
    %c0_15 = arith.constant 0 : index
    %c1 = arith.constant 1 : index
    %37 = vector.load %arg4[%c0_15, %c1] : memref<32x8xf32, #tpu.memory_space<vmem>>, vector<32x1xf32>
    %c0_16 = arith.constant 0 : index
    %c2 = arith.constant 2 : index
    %38 = vector.load %arg4[%c0_16, %c2] : memref<32x8xf32, #tpu.memory_space<vmem>>, vector<32x1xf32>
    %c0_17 = arith.constant 0 : index
    %c3 = arith.constant 3 : index
    %39 = vector.load %arg4[%c0_17, %c3] : memref<32x8xf32, #tpu.memory_space<vmem>>, vector<32x1xf32>
    %40 = vector.broadcast %39 : vector<32x1xf32> to vector<32x512xf32>
    %41 = vector.broadcast %27 : vector<1x512xf32> to vector<32x512xf32>
    %42 = arith.mulf %40, %41 : vector<32x512xf32>
    %c0_18 = arith.constant 0 : index
    %c4 = arith.constant 4 : index
    %43 = vector.load %arg4[%c0_18, %c4] : memref<32x8xf32, #tpu.memory_space<vmem>>, vector<32x1xf32>
    %44 = vector.broadcast %43 : vector<32x1xf32> to vector<32x512xf32>
    %45 = vector.broadcast %36 : vector<1x512xf32> to vector<32x512xf32>
    %46 = arith.mulf %44, %45 : vector<32x512xf32>
    %47 = arith.addf %42, %46 : vector<32x512xf32>
    %48 = vector.broadcast %38 : vector<32x1xf32> to vector<32x512xf32>
    %49 = arith.mulf %48, %19 : vector<32x512xf32>
    %50 = vector.broadcast %37 : vector<32x1xf32> to vector<32x512xf32>
    %51 = arith.addf %49, %50 : vector<32x512xf32>
    %52 = arith.mulf %51, %19 : vector<32x512xf32>
    %53 = arith.addf %52, %47 : vector<32x512xf32>
    %c0_19 = arith.constant 0 : index
    %c0_20 = arith.constant 0 : index
    %54 = vector.load %arg5[%c0_19, %c0_20] : memref<32x512xf32, #tpu.memory_space<vmem>>, vector<32x512xf32>
    tpu.vector_store %arg5[%c0_19, %c0_20], %53 {strides = array<i32>} : memref<32x512xf32, #tpu.memory_space<vmem>>, vector<32x512xf32>,
    return
  }
  func.func @transform_0(%arg0: i32) -> (i32, i32) {
    %c0_i32 = arith.constant 0 : i32
    %c0_i32_0 = arith.constant 0 : i32
    return %c0_i32, %arg0 : i32, i32
  }
  func.func @transform_1(%arg0: i32) -> (i32, i32) {
    %c0_i32 = arith.constant 0 : i32
    %c0_i32_0 = arith.constant 0 : i32
    %c0_i32_1 = arith.constant 0 : i32
    return %c0_i32, %c0_i32_0 : i32, i32
  }
  func.func @transform_2(%arg0: i32) -> (i32, i32) {
    %c0_i32 = arith.constant 0 : i32
    %c0_i32_0 = arith.constant 0 : i32
    %c0_i32_1 = arith.constant 0 : i32
    return %c0_i32, %c0_i32_0 : i32, i32
  }
  func.func @transform_3(%arg0: i32) -> (i32, i32) {
    %c0_i32 = arith.constant 0 : i32
    %c0_i32_0 = arith.constant 0 : i32
    %c0_i32_1 = arith.constant 0 : i32
    return %c0_i32, %c0_i32_0 : i32, i32
  }
  func.func @transform_4(%arg0: i32) -> (i32, i32) {
    %c0_i32 = arith.constant 0 : i32
    %c0_i32_0 = arith.constant 0 : i32
    return %c0_i32, %arg0 : i32, i32
  }
}

</mosaic_0001>

<bundles_post_ra>
// kernel: squeeze.4
= control target key start
LH: loop header
LB: loop body
LE: loop exit
PB: predicated region body
PF: predicated region fallthrough
CT: control target
= control target key end

     0   :  { %s172_s10 = smov 80   ;;  %vm67_vm0 = vcmask 130048   ;;  %s173_s11 = smov 96   ;;  %vm73_vm1 = vcmask 1048448   ;;  %vm79_vm2 = vcmask 917248   ;;  %vm85_vm3 = vcmask 786048   ;;  %s207_s0 = inlined_call_operand.vmem [shape: bf16[2,1,16,16], index: 0, kind: input, shape index: {}]   ;;  %s208_s1 = inlined_call_operand.vmem [shape: bf16[1,512], index: 1, kind: output, shape index: {}]  }
   0x1   :  { %v162_v0 = vld [vmem:[%s207_s0 + $0x8] sm:$0xff]   ;;  %v159_v1 = vld [vmem:[%s207_s0] sm:$0xff]   ;;  %s171_s0 = smov 112   ;;  %s174_s12 = smov 64   ;;  %vm91_vm4 = vcmask 654848   ;;  %vm97_vm5 = vcmask 523648  }
   0x2   :  { %v156_v2 = vunpack.c.l.bf16 %v162_v0  ;;  %v157_v3 = vunpack.c.h.bf16 %v162_v0  ;;  %v160_v4 = vunpack.c.l.bf16 %v159_v1  ;;  %v161_v5 = vunpack.c.h.bf16 %v159_v1  ;;  %s175_s13 = smov 48   ;;  %s176_s14 = smov 32  }
   0x3   :  { %s177_s15 = smov 16   ;;  %vm103_vm6 = vcmask 392448   ;;  %vm109_vm7 = vcmask 261248   ;;  %v178_v24 = vmov 0.0  }
   0x4   :  { %21 = vst [vmem:[#allocation1 + $0x18] sm:$0xff] %v157_v3  ;;  %37 = vst [vmem:[#allocation1 + $0x10] sm:$0xff] %v156_v2 }
   0x5   :  { %52 = vst [vmem:[#allocation1 + $0x8] sm:$0xff] %v161_v5  ;;  %65 = vst [vmem:[#allocation1] sm:$0xff] %v160_v4 }
   0xc   :  { %v70_v6 = vld [vmem:[#allocation1 + $0x7] ss:$8 sm:$0xf]   ;;  %v82_v7 = vld [vmem:[#allocation1 + $0x5] ss:$8 sm:$0xf]  }
   0xd   :  { %71 = vrot.lane.b32.xlu0 %v70_v6, %s171_s0  ;;  %83 = vrot.lane.b32.xlu1 %v82_v7, %s172_s10  ;;  %v76_v8 = vld [vmem:[#allocation1 + $0x6] ss:$8 sm:$0xf]   ;;  %v88_v9 = vld [vmem:[#allocation1 + $0x4] ss:$8 sm:$0xf]  }
   0xe   :  { %v66_v10 = vld [vmem:[#allocation1] ss:$8 sm:$0xf]   ;;  %v94_v11 = vld [vmem:[#allocation1 + $0x3] ss:$8 sm:$0xf]  }
   0xf   :  { %68 = vst.msk [vmem:[#allocation0] ss:$8 sm:$0xf] %vm67_vm0, %v66_v10   ;;  %v100_v12 = vld [vmem:[#allocation1 + $0x2] ss:$8 sm:$0xf]  }
  0x10   :  { %v106_v13 = vld [vmem:[#allocation1 + $0x1] ss:$8 sm:$0xf]  }
  0x11   :  { %77 = vrot.lane.b32.xlu0 %v76_v8, %s173_s11  ;;  %89 = vrot.lane.b32.xlu1 %v88_v9, %s174_s12 }
  0x15   :  { %95 = vrot.lane.b32.xlu0 %v94_v11, %s175_s13  ;;  %101 = vrot.lane.b32.xlu1 %v100_v12, %s176_s14 }
  0x19   :  { %107 = vrot.lane.b32.xlu0 %v106_v13, %s177_s15 }
  0x7f   :  { %v72_v14 = vpop.permute.xlu0 %71   ;;  %v84_v15 = vpop.permute.xlu1 %83  }
  0x80   :  { %74 = vst.msk [vmem:[#allocation0] ss:$8 sm:$0xf] %vm73_vm1, %v72_v14  }
  0x83   :  { %v78_v16 = vpop.permute.xlu0 %77   ;;  %v90_v17 = vpop.permute.xlu1 %89  }
  0x84   :  { %80 = vst.msk [vmem:[#allocation0] ss:$8 sm:$0xf] %vm79_vm2, %v78_v16  }
  0x85   :  { %86 = vst.msk [vmem:[#allocation0] ss:$8 sm:$0xf] %vm85_vm3, %v84_v15  }
  0x86   :  { %92 = vst.msk [vmem:[#allocation0] ss:$8 sm:$0xf] %vm91_vm4, %v90_v17  }
  0x87   :  { %v96_v18 = vpop.permute.xlu0 %95   ;;  %v102_v19 = vpop.permute.xlu1 %101  }
  0x88   :  { %98 = vst.msk [vmem:[#allocation0] ss:$8 sm:$0xf] %vm97_vm5, %v96_v18  }
  0x89   :  { %104 = vst.msk [vmem:[#allocation0] ss:$8 sm:$0xf] %vm103_vm6, %v102_v19  }
  0x8b   :  { %v108_v20 = vpop.permute.xlu0 %107  }
  0x8c   :  { %110 = vst.msk [vmem:[#allocation0] ss:$8 sm:$0xf] %vm109_vm7, %v108_v20  }
  0x93   :  { %v116_v21 = vld [vmem:[#allocation0] sm:$0x3]  ;;  %v122_v22 = vld [vmem:[#allocation0 + $0x8] sm:$0x3]  ;;  %v129_v23 = vld [vmem:[#allocation0 + $0x10] sm:$0x3] }
  0x94   :  { %v117_v25 = vpack.c.bf16 %v178_v24, %v116_v21  ;;  %v123_v26 = vpack.c.bf16 %v178_v24, %v122_v22  ;;  %v130_v27 = vpack.c.bf16 %v178_v24, %v129_v23  ;;  %v137_v28 = vld [vmem:[#allocation0 + $0x18] sm:$0x3] }
  0x95   :  { %v138_v29 = vpack.c.bf16 %v178_v24, %v137_v28 }
  0x96   :  { %120 = vst [vmem:[%s208_s1] sm:$0x1] %v117_v25  ;;  %151 = vst [vmem:[%s208_s1 + $0x1] sm:$0x1] %v123_v26 }
  0x97   :  { %152 = vst [vmem:[%s208_s1 + $0x2] sm:$0x1] %v130_v27  ;;  %153 = vst [vmem:[%s208_s1 + $0x3] sm:$0x1] %v138_v29 }

// kernel: traced_model_forward.1
= control target key start
LH: loop header
LB: loop body
LE: loop exit
PB: predicated region body
PF: predicated region fallthrough
CT: control target
= control target key end

     0   :  { %v882_v1 = vmov 0   ;;  %vm73_vm0 = vcmask 261120   ;;  %v883_v14 = vmov 2   ;;  %v884_v15 = vmov 3   ;;  %s1169_s0 = inlined_call_operand.vmem [shape: bf16[32,512], index: 0, kind: input, shape index: {}]   ;;  %s1170_s1 = inlined_call_operand.vmem [shape: bf16[16,32], index: 1, kind: input, shape index: {}]   ;;  %s1171_s2 = inlined_call_operand.vmem [shape: bf16[32,16], index: 2, kind: input, shape index: {}]   ;;  %s1172_s3 = inlined_call_operand.vmem [shape: f32[32,8], index: 3, kind: input, shape index: {}]   ;;  %s1173_s4 = inlined_call_operand.vmem [shape: f32[32,512], index: 4, kind: output, shape index: {}]  }
   0x1   :  { %v771_v0 = vld [vmem:[%s1169_s0 + $0x24] ss:$16 sps:$4 sm:$0xff]   ;;  %109 = vmatprep.mubr.bf16.mxu0 %v882_v1  ;;  %152 = vmatprep.mubr.bf16.mxu1 %v882_v1  ;;  %v773_v2 = vld [vmem:[%s1169_s0 + $0x2c] ss:$16 sps:$4 sm:$0xff]   ;;  %v775_v3 = vld [vmem:[%s1169_s0 + $0x20] ss:$16 sps:$4 sm:$0xff]  }
   0x2   :  { %762 = vset.pattern.permute.xlu1 %v882_v1  ;;  %761 = vset.pattern.permute.xlu0 %v882_v1  ;;  %v776_v4 = vld [vmem:[%s1169_s0 + $0x28] ss:$16 sps:$4 sm:$0xff]   ;;  %v777_v5 = vld [vmem:[%s1169_s0 + $0x4] ss:$16 sps:$4 sm:$0xff]   ;;  %v779_v6 = vld [vmem:[%s1169_s0 + $0xc] ss:$16 sps:$4 sm:$0xff]  }
   0x3   :  { %89 = vmatprep.subr.bf16.mxu0 %v771_v0  ;;  %132 = vmatprep.subr.bf16.mxu1 %v773_v2  ;;  %v781_v7 = vld [vmem:[%s1169_s0] ss:$16 sps:$4 sm:$0xff]   ;;  %v782_v8 = vld [vmem:[%s1169_s0 + $0x8] ss:$16 sps:$4 sm:$0xff]   ;;  %v885_v16 = vmov 4   ;;  %v886_v17 = vmov 1  }
   0x4   :  { %90 = vmatpush1.bf16.msra.mxu0 %v775_v3  ;;  %133 = vmatpush1.bf16.msra.mxu1 %v776_v4  ;;  %v783_v9 = vld [vmem:[%s1170_s1] sm:$0xff]   ;;  %v229_v10 = vld [vmem:[%s1172_s3 + $0x10] sm:$0xff]  ;;  %v230_v12 = vld [vmem:[%s1172_s3 + $0x18] sm:$0xff]  ;;  %vm261_vm1 = vcmask 130048  }
   0x5   :  { %91 = vmatprep.subr.bf16.mxu0 %v777_v5  ;;  %134 = vmatprep.subr.bf16.mxu1 %v779_v6  ;;  %v227_v11 = vld [vmem:[%s1172_s3] sm:$0xff]  ;;  %v228_v13 = vld [vmem:[%s1172_s3 + $0x8] sm:$0xff] }
   0x6   :  { %243 = vperm.xlu1 %762, %v229_v10   ;;  %233 = vperm.xlu0 %761, %v227_v11  }
   0x8   :  { %92 = vmatpush1.bf16.msra.mxu0 %v781_v7  ;;  %135 = vmatpush1.bf16.msra.mxu1 %v782_v8  ;;  %v784_v7 = vld [vmem:[%s1171_s2] sm:$0xff]   ;;  %v785_v8 = vld [vmem:[%s1171_s2 + $0x8] sm:$0xff]  }
   0xa   :  { %248 = vperm.xlu1 %762, %v230_v12   ;;  %238 = vperm.xlu0 %761, %v228_v13  }
   0xb   :  { %716 = vmatmul.mubr.msk.bf16.vlgmr.msra.gmra.mxu0 %vm73_vm0, %v783_v9  ;;  %717 = vmatmul.mubr.msk.bf16.vlgmr.msra.gmra.mxu1 %vm73_vm0, %v783_v9 }
   0xc   :  { %300 = vmatprep.mubr.bf16.mxu0 %v882_v1  ;;  %353 = vmatprep.mubr.bf16.mxu1 %v882_v1 }
   0xe   :  { %764 = vset.pattern.permute.xlu1 %v883_v14  ;;  %763 = vset.pattern.permute.xlu0 %v883_v14 }
   0xf   :  { %596 = vperm.xlu1 %764, %v228_v13   ;;  %592 = vperm.xlu0 %763, %v227_v11  }
  0x13   :  { %600 = vperm.xlu1 %764, %v229_v10   ;;  %604 = vperm.xlu0 %763, %v230_v12  }
  0x17   :  { %765 = vset.pattern.permute.xlu1 %v884_v15  ;;  %766 = vset.pattern.permute.xlu0 %v884_v15 }
  0x18   :  { %512 = vperm.xlu1 %765, %v227_v11   ;;  %516 = vperm.xlu0 %766, %v228_v13  }
  0x1c   :  { %520 = vperm.xlu1 %765, %v229_v10   ;;  %767 = vset.pattern.permute.xlu0 %v885_v16 }
  0x1d   :  { %544 = vperm.xlu0 %767, %v227_v11  }
  0x20   :  { %524 = vperm.xlu1 %765, %v230_v12  }
  0x21   :  { %556 = vperm.xlu0 %767, %v230_v12  }
  0x24   :  { %768 = vset.pattern.permute.xlu1 %v885_v16 }
  0x25   :  { %548 = vperm.xlu1 %768, %v228_v13   ;;  %770 = vset.pattern.permute.xlu0 %v886_v17 }
  0x26   :  { %628 = vperm.xlu0 %770, %v228_v13  }
  0x29   :  { %552 = vperm.xlu1 %768, %v229_v10  }
  0x2d   :  { %769 = vset.pattern.permute.xlu1 %v886_v17 }
  0x2e   :  { %624 = vperm.xlu1 %769, %v227_v11   ;;  %v470_v11 = vlaneseq }
  0x32   :  { %632 = vperm.xlu1 %769, %v229_v10  }
  0x36   :  { %636 = vperm.xlu1 %769, %v230_v12   ;;  %v471_v12 = vand.u32 127, %v470_v11 }
  0x38   :  { %v472_v14 = vadd.s32 128, %v471_v12  ;;  %v473_v15 = vadd.s32 256, %v471_v12  ;;  %v474_v16 = vadd.s32 384, %v471_v12 }
  0x81   :  { %v965_v9 = vpop.permute.xlu1 %243  ;;  %v234_v17 = vpop.permute.xlu0 %233 }
  0x85   :  { %v967_v10 = vpop.permute.xlu1 %248 }
  0x8a   :  { %v969_v13 = vpop.permute.xlu1 %596 }
  0xcb   :  { %v111_v18 = vpop.f32.mrf.mxu0  ;;  %v154_v19 = vpop.f32.mrf.mxu1 }
  0xcc   :  { %v718_v20 = vmul.f32 -1.442695, %v111_v18  ;;  %v720_v21 = vmul.f32 -1.442695, %v154_v19 }
  0xcd   :  { %v113_v22 = vpop.f32.mrf.mxu0  ;;  %v156_v23 = vpop.f32.mrf.mxu1 }
  0xce   :  { %786 = vpow2.f32 %v718_v20  ;;  %v719_v24 = vmul.f32 -1.442695, %v113_v22  ;;  %v721_v25 = vmul.f32 -1.442695, %v156_v23  ;;  %v493_v20 = vshra.s32 %v473_v15, 4 }
  0xcf   :  { %788 = vpow2.f32 %v720_v21  ;;  %v115_v26 = vpop.f32.mrf.mxu0  ;;  %v158_v27 = vpop.f32.mrf.mxu1  ;;  %v494_v21 = vshra.s32 %v474_v16, 4 }
  0xd0   :  { %790 = vpow2.f32 %v719_v24  ;;  %v722_v28 = vmul.f32 -1.442695, %v115_v26  ;;  %v724_v29 = vmul.f32 -1.442695, %v158_v27  ;;  %v477_v24 = vand.u32 15, %v473_v15 }
  0xd1   :  { %792 = vpow2.f32 %v721_v25  ;;  %v117_v30 = vpop.f32.mrf.mxu0  ;;  %v160_v31 = vpop.f32.mrf.mxu1 }
  0xd2   :  { %794 = vpow2.f32 %v722_v28  ;;  %v723_v32 = vmul.f32 -1.442695, %v117_v30  ;;  %v725_v33 = vmul.f32 -1.442695, %v160_v31  ;;  %v239_v25 = vpop.permute.xlu0 %238 }
  0xd3   :  { %796 = vpow2.f32 %v724_v29 }
  0xd4   :  { %798 = vpow2.f32 %v723_v32 }
  0xd5   :  { %800 = vpow2.f32 %v725_v33 }
  0xdb   :  { %v787_v34 = vpop.eup %786 }
  0xdc   :  { %v789_v35 = vpop.eup %788  ;;  %v187_v36 = vadd.f32 1.0, %v787_v34 }
  0xdd   :  { %v791_v37 = vpop.eup %790  ;;  %v189_v38 = vadd.f32 1.0, %v789_v35 }
  0xde   :  { %v793_v39 = vpop.eup %792  ;;  %802 = vrcp.f32 %v187_v36  ;;  %v188_v40 = vadd.f32 1.0, %v791_v37  ;;  %v481_v37 = vcvt.s32.f32 %v477_v24 }
  0xdf   :  { %v795_v41 = vpop.eup %794  ;;  %804 = vrcp.f32 %v189_v38  ;;  %v190_v42 = vadd.f32 1.0, %v793_v39 }
  0xe0   :  { %v797_v43 = vpop.eup %796  ;;  %806 = vrcp.f32 %v188_v40  ;;  %v191_v44 = vadd.f32 1.0, %v795_v41 }
  0xe1   :  { %v799_v45 = vpop.eup %798  ;;  %808 = vrcp.f32 %v190_v42  ;;  %v193_v46 = vadd.f32 1.0, %v797_v43 }
  0xe2   :  { %v801_v47 = vpop.eup %800  ;;  %810 = vrcp.f32 %v191_v44  ;;  %v192_v48 = vadd.f32 1.0, %v799_v45 }
  0xe3   :  { %812 = vrcp.f32 %v193_v46  ;;  %v194_v49 = vadd.f32 1.0, %v801_v47 }
  0xe4   :  { %814 = vrcp.f32 %v192_v48 }
  0xe5   :  { %816 = vrcp.f32 %v194_v49 }
  0xeb   :  { %v803_v50 = vpop.eup %802 }
  0xec   :  { %v805_v51 = vpop.eup %804  ;;  %v211_v62 = vmul.f32 %v803_v50, %v111_v18  ;;  %v971_v18 = vpop.permute.xlu1 %600 }
  0xed   :  { %v807_v52 = vpop.eup %806  ;;  %v213_v2 = vmul.f32 %v805_v51, %v154_v19  ;;  %v492_v19 = vshra.s32 %v472_v14, 4 }
  0xee   :  { %v809_v53 = vpop.eup %808  ;;  %v212_v59 = vmul.f32 %v807_v52, %v113_v22  ;;  %v475_v22 = vand.u32 15, %v471_v12 }
  0xef   :  { %v811_v54 = vpop.eup %810  ;;  %v214_v63 = vmul.f32 %v809_v53, %v156_v23  ;;  %v476_v23 = vand.u32 15, %v472_v14  ;;  %v496_v28 = vand.u32 15, %v492_v19  ;;  %v975_v53 = vpop.permute.xlu0 %592 }
  0xf0   :  { %v813_v55 = vpop.eup %812  ;;  %v215_v57 = vmul.f32 %v811_v54, %v115_v26  ;;  %v478_v26 = vand.u32 15, %v474_v16  ;;  %v973_v29 = vpop.permute.xlu1 %512  ;;  %v479_v33 = vcvt.s32.f32 %v475_v22 }
  0xf1   :  { %v815_v56 = vpop.eup %814  ;;  %v217_v60 = vmul.f32 %v813_v55, %v158_v27  ;;  %v480_v34 = vcvt.s32.f32 %v476_v23  ;;  %v500_v42 = vcvt.s32.f32 %v496_v28 }
  0xf2   :  { %v817_v58 = vpop.eup %816  ;;  %v216_v61 = vmul.f32 %v815_v56, %v117_v30  ;;  %v223_v4 = vpack.c.bf16 %v215_v57, %v211_v62  ;;  %v497_v30 = vand.u32 15, %v493_v20  ;;  %v482_v40 = vcvt.s32.f32 %v478_v26 }
  0xf3   :  { %v218_v0 = vmul.f32 %v817_v58, %v160_v31  ;;  %v225_v6 = vpack.c.bf16 %v217_v60, %v213_v2  ;;  %v498_v31 = vand.u32 15, %v494_v21  ;;  %v748_v51 = vadd.f32 -0.5, %v479_v33 }
  0xf4   :  { %v224_v3 = vpack.c.bf16 %v216_v61, %v212_v59  ;;  %v501_v46 = vcvt.s32.f32 %v497_v30  ;;  %v749_v52 = vadd.f32 -0.5, %v480_v34  ;;  %v750_v57 = vadd.f32 -0.5, %v481_v37  ;;  %v977_v58 = vpop.permute.xlu1 %520 }
  0xf5   :  { %v226_v5 = vpack.c.bf16 %v218_v0, %v214_v63  ;;  %v502_v47 = vcvt.s32.f32 %v498_v31  ;;  %v751_v62 = vadd.f32 -0.5, %v482_v40  ;;  %v983_v21 = vmul.f32 8.0, %v748_v51 }
  0xf6   :  { %282 = vmatprep.subr.bf16.mxu0 %v224_v3  ;;  %v754_v14 = vadd.f32 -0.5, %v501_v46  ;;  %v986_v26 = vmul.f32 8.0, %v749_v52  ;;  %v989_v30 = vmul.f32 8.0, %v750_v57 }
  0xf7   :  { %335 = vmatprep.subr.bf16.mxu1 %v226_v5  ;;  %283 = vmatpush1.bf16.msra.mxu0 %v223_v4  ;;  %v755_v19 = vadd.f32 -0.5, %v502_v47  ;;  %v992_v34 = vmul.f32 8.0, %v751_v62 }
  0xf8   :  { %336 = vmatpush1.bf16.msra.mxu1 %v225_v6  ;;  %v525_v24 = vpop.permute.xlu1 %524  ;;  %v1003_v46 = vmul.f32 8.0, %v754_v14  ;;  %v528_v51 = vmul.f32 %v973_v29, %v986_v26 }
  0xf9   :  { %v1005_v47 = vmul.f32 8.0, %v755_v19 }
  0xfa   :  { %728 = vmatmul.mubr.msk.bf16.vlgmr.msra.gmra.mxu0 %vm261_vm1, %v784_v7 }
  0xfb   :  { %730 = vmatmul.mubr.msk.bf16.vlgmr.msra.gmra.mxu1 %vm261_vm1, %v784_v7  ;;  %310 = vmatprep.mubr.bf16.mxu0 %v882_v1  ;;  %v753_v7 = vadd.f32 -0.5, %v500_v42 }
  0xfc   :  { %363 = vmatprep.mubr.bf16.mxu1 %v882_v1  ;;  %v491_v1 = vshra.s32 %v471_v12, 4 }
  0xfe   :  { %v495_v27 = vand.u32 15, %v491_v1  ;;  %v981_v1 = vpop.permute.xlu0 %604 }
 0x100   :  { %v499_v41 = vcvt.s32.f32 %v495_v27 }
 0x102   :  { %729 = vmatmul.mubr.msk.bf16.gmra.mxu0 %vm261_vm1, %v785_v8  ;;  %v752_v3 = vadd.f32 -0.5, %v499_v41 }
 0x103   :  { %731 = vmatmul.mubr.msk.bf16.gmra.mxu1 %vm261_vm1, %v785_v8 }
 0x104   :  { %v996_v40 = vmul.f32 8.0, %v752_v3 }
 0x1ba   :  { %v302_v32 = vpop.f32.mrf.mxu0 }
 0x1bb   :  { %v303_v35 = vadd.f32 %v302_v32, %v234_v17  ;;  %v355_v36 = vpop.f32.mrf.mxu1 }
 0x1bc   :  { %v356_v38 = vadd.f32 %v355_v36, %v234_v17  ;;  %v304_v39 = vpop.f32.mrf.mxu0 }
 0x1bd   :  { %v732_v43 = vmul.f32 -1.442695, %v303_v35  ;;  %v305_v44 = vadd.f32 %v304_v39, %v234_v17  ;;  %v357_v45 = vpop.f32.mrf.mxu1 }
 0x1be   :  { %v734_v48 = vmul.f32 -1.442695, %v356_v38  ;;  %v358_v49 = vadd.f32 %v357_v45, %v234_v17  ;;  %v306_v50 = vpop.f32.mrf.mxu0  ;;  %v1001_v45 = vpop.permute.xlu0 %516 }
 0x1bf   :  { %818 = vpow2.f32 %v732_v43  ;;  %v733_v54 = vmul.f32 -1.442695, %v305_v44  ;;  %v307_v55 = vadd.f32 %v306_v50, %v239_v25  ;;  %v359_v56 = vpop.f32.mrf.mxu1  ;;  %v999_v43 = vmul.f32 8.0, %v753_v7 }
 0x1c0   :  { %820 = vpow2.f32 %v734_v48  ;;  %v735_v59 = vmul.f32 -1.442695, %v358_v49  ;;  %v360_v60 = vadd.f32 %v359_v56, %v239_v25  ;;  %v308_v61 = vpop.f32.mrf.mxu0  ;;  %v1007_v48 = vpop.permute.xlu1 %548  ;;  %v527_v50 = vmul.f32 %v973_v29, %v983_v21 }
 0x1c1   :  { %822 = vpow2.f32 %v733_v54  ;;  %v736_v63 = vmul.f32 -1.442695, %v307_v55  ;;  %v309_v0 = vadd.f32 %v308_v61, %v239_v25  ;;  %v361_v2 = vpop.f32.mrf.mxu1  ;;  %v529_v55 = vmul.f32 %v973_v29, %v989_v30 }
 0x1c2   :  { %824 = vpow2.f32 %v735_v59  ;;  %v738_v4 = vmul.f32 -1.442695, %v360_v60  ;;  %v362_v5 = vadd.f32 %v361_v2, %v239_v25  ;;  %v312_v6 = vpop.f32.mrf.mxu0  ;;  %v530_v56 = vmul.f32 %v973_v29, %v992_v34 }
 0x1c3   :  { %826 = vpow2.f32 %v736_v63  ;;  %v737_v8 = vmul.f32 -1.442695, %v309_v0  ;;  %v313_v11 = vadd.f32 %v312_v6, %v965_v9  ;;  %v365_v12 = vpop.f32.mrf.mxu1  ;;  %v535_v60 = vmul.f32 %v977_v58, %v983_v21 }
 0x1c4   :  { %828 = vpow2.f32 %v738_v4  ;;  %v739_v15 = vmul.f32 -1.442695, %v362_v5  ;;  %v366_v16 = vadd.f32 %v365_v12, %v965_v9  ;;  %v314_v17 = vpop.f32.mrf.mxu0  ;;  %v536_v61 = vmul.f32 %v977_v58, %v986_v26  ;;  %v545_v12 = vpop.permute.xlu0 %544 }
 0x1c5   :  { %830 = vpow2.f32 %v737_v8  ;;  %v740_v20 = vmul.f32 -1.442695, %v313_v11  ;;  %v315_v22 = vadd.f32 %v314_v17, %v965_v9  ;;  %v367_v23 = vpop.f32.mrf.mxu1  ;;  %v537_v0 = vmul.f32 %v977_v58, %v989_v30 }
 0x1c6   :  { %832 = vpow2.f32 %v739_v15  ;;  %v742_v25 = vmul.f32 -1.442695, %v366_v16  ;;  %v368_v27 = vadd.f32 %v367_v23, %v965_v9  ;;  %v316_v28 = vpop.f32.mrf.mxu0  ;;  %v538_v2 = vmul.f32 %v977_v58, %v992_v34  ;;  %v553_v58 = vpop.permute.xlu1 %552 }
 0x1c7   :  { %834 = vpow2.f32 %v740_v20  ;;  %v741_v31 = vmul.f32 -1.442695, %v315_v22  ;;  %v317_v32 = vadd.f32 %v316_v28, %v967_v10  ;;  %v369_v33 = vpop.f32.mrf.mxu1  ;;  %v1026_v4 = vmul.f32 %v525_v24, %v983_v21 }
 0x1c8   :  { %836 = vpow2.f32 %v742_v25  ;;  %v743_v35 = vmul.f32 -1.442695, %v368_v27  ;;  %v370_v36 = vadd.f32 %v369_v33, %v967_v10  ;;  %v318_v37 = vpop.f32.mrf.mxu0  ;;  %v1029_v5 = vmul.f32 %v525_v24, %v986_v26 }
 0x1c9   :  { %838 = vpow2.f32 %v741_v31  ;;  %v744_v38 = vmul.f32 -1.442695, %v317_v32  ;;  %v319_v39 = vadd.f32 %v318_v37, %v967_v10  ;;  %v371_v9 = vpop.f32.mrf.mxu1  ;;  %v1032_v8 = vmul.f32 %v525_v24, %v989_v30 }
 0x1ca   :  { %840 = vpow2.f32 %v743_v35  ;;  %v746_v41 = vmul.f32 -1.442695, %v370_v36  ;;  %v372_v42 = vadd.f32 %v371_v9, %v967_v10  ;;  %v1035_v11 = vmul.f32 %v525_v24, %v992_v34 }
 0x1cb   :  { %842 = vpow2.f32 %v744_v38  ;;  %v745_v44 = vmul.f32 -1.442695, %v319_v39  ;;  %v559_v16 = vmul.f32 %v545_v12, %v996_v40  ;;  %v560_v17 = vmul.f32 %v545_v12, %v999_v43 }
 0x1cc   :  { %v819_v49 = vpop.eup %818  ;;  %844 = vpow2.f32 %v746_v41  ;;  %v747_v10 = vmul.f32 -1.442695, %v372_v42  ;;  %v561_v22 = vmul.f32 %v545_v12, %v1003_v46  ;;  %v562_v23 = vmul.f32 %v545_v12, %v1005_v47 }
 0x1cd   :  { %v821_v52 = vpop.eup %820  ;;  %v422_v54 = vadd.f32 1.0, %v819_v49  ;;  %846 = vpow2.f32 %v745_v44  ;;  %v567_v27 = vmul.f32 %v553_v58, %v996_v40  ;;  %v568_v28 = vmul.f32 %v553_v58, %v999_v43  ;;  %v557_v49 = vpop.permute.xlu0 %556 }
 0x1ce   :  { %v823_v57 = vpop.eup %822  ;;  %v424_v59 = vadd.f32 1.0, %v821_v52  ;;  %848 = vpow2.f32 %v747_v10  ;;  %v569_v33 = vmul.f32 %v553_v58, %v1003_v46  ;;  %v570_v35 = vmul.f32 %v553_v58, %v1005_v47 }
 0x1cf   :  { %v825_v62 = vpop.eup %824  ;;  %850 = vrcp.f32 %v422_v54  ;;  %v423_v63 = vadd.f32 1.0, %v823_v57  ;;  %v1045_v38 = vadd.f32 %v559_v16, %v527_v50  ;;  %v1047_v39 = vadd.f32 %v560_v17, %v528_v51  ;;  %v625_v17 = vpop.permute.xlu1 %624 }
 0x1d0   :  { %v827_v29 = vpop.eup %826  ;;  %852 = vrcp.f32 %v424_v59  ;;  %v425_v3 = vadd.f32 1.0, %v825_v62  ;;  %v1049_v42 = vadd.f32 %v561_v22, %v529_v55  ;;  %v1051_v44 = vadd.f32 %v562_v23, %v530_v56 }
 0x1d1   :  { %v829_v6 = vpop.eup %828  ;;  %854 = vrcp.f32 %v423_v63  ;;  %v426_v7 = vadd.f32 1.0, %v827_v29  ;;  %v1053_v54 = vadd.f32 %v567_v27, %v535_v60  ;;  %v1055_v57 = vadd.f32 %v568_v28, %v536_v61 }
 0x1d2   :  { %v831_v14 = vpop.eup %830  ;;  %856 = vrcp.f32 %v425_v3  ;;  %v428_v15 = vadd.f32 1.0, %v829_v6  ;;  %v1057_v51 = vadd.f32 %v569_v33, %v537_v0  ;;  %v1059_v62 = vadd.f32 %v570_v35, %v538_v2 }
 0x1d3   :  { %v833_v19 = vpop.eup %832  ;;  %858 = vrcp.f32 %v426_v7  ;;  %v427_v20 = vadd.f32 1.0, %v831_v14  ;;  %v1062_v56 = vmul.f32 %v557_v49, %v996_v40  ;;  %v1065_v29 = vmul.f32 %v557_v49, %v999_v43 }
 0x1d4   :  { %v835_v25 = vpop.eup %834  ;;  %860 = vrcp.f32 %v428_v15  ;;  %v429_v24 = vadd.f32 1.0, %v833_v19  ;;  %v531_v3 = vmul.f32 %v1001_v45, %v983_v21  ;;  %v532_v0 = vmul.f32 %v1001_v45, %v986_v26 }
 0x1d5   :  { %v837_v31 = vpop.eup %836  ;;  %862 = vrcp.f32 %v427_v20  ;;  %v430_v32 = vadd.f32 1.0, %v835_v25  ;;  %v563_v7 = vmul.f32 %v1007_v48, %v996_v40  ;;  %v564_v12 = vmul.f32 %v1007_v48, %v999_v43 }
 0x1d6   :  { %v839_v36 = vpop.eup %838  ;;  %864 = vrcp.f32 %v429_v24  ;;  %v432_v37 = vadd.f32 1.0, %v837_v31  ;;  %v533_v15 = vmul.f32 %v1001_v45, %v989_v30  ;;  %v565_v21 = vmul.f32 %v1007_v48, %v1003_v46 }
 0x1d7   :  { %v841_v9 = vpop.eup %840  ;;  %866 = vrcp.f32 %v430_v32  ;;  %v431_v41 = vadd.f32 1.0, %v839_v36  ;;  %v534_v40 = vmul.f32 %v1001_v45, %v992_v34  ;;  %v566_v43 = vmul.f32 %v1007_v48, %v1005_v47  ;;  %v629_v45 = vpop.permute.xlu0 %628 }
 0x1d8   :  { %v843_v10 = vpop.eup %842  ;;  %868 = vrcp.f32 %v432_v37  ;;  %v433_v52 = vadd.f32 1.0, %v841_v9  ;;  %v1087_v22 = vmul.f32 %v557_v49, %v1003_v46  ;;  %v1090_v30 = vmul.f32 %v557_v49, %v1005_v47 }
 0x1d9   :  { %v845_v59 = vpop.eup %844  ;;  %870 = vrcp.f32 %v431_v41  ;;  %v434_v50 = vadd.f32 1.0, %v843_v10  ;;  %v579_v27 = vadd.f32 %v563_v7, %v531_v3  ;;  %v580_v28 = vadd.f32 %v564_v12, %v532_v0 }
 0x1da   :  { %v847_v63 = vpop.eup %846  ;;  %872 = vrcp.f32 %v433_v52  ;;  %v436_v55 = vadd.f32 1.0, %v845_v59  ;;  %v581_v48 = vadd.f32 %v565_v21, %v533_v15  ;;  %v582_v46 = vadd.f32 %v566_v43, %v534_v40 }
 0x1db   :  { %v849_v60 = vpop.eup %848  ;;  %874 = vrcp.f32 %v434_v50  ;;  %v435_v61 = vadd.f32 1.0, %v847_v63 }
 0x1dc   :  { %v851_v2 = vpop.eup %850  ;;  %876 = vrcp.f32 %v436_v55  ;;  %v437_v6 = vadd.f32 1.0, %v849_v60 }
 0x1dd   :  { %v853_v58 = vpop.eup %852  ;;  %v607_v14 = vmul.f32 %v851_v2, %v975_v53  ;;  %878 = vrcp.f32 %v435_v61  ;;  %v633_v61 = vpop.permute.xlu1 %632 }
 0x1de   :  { %v855_v26 = vpop.eup %854  ;;  %v609_v16 = vmul.f32 %v853_v58, %v975_v53  ;;  %880 = vrcp.f32 %v437_v6 }
 0x1df   :  { %v857_v19 = vpop.eup %856  ;;  %v608_v20 = vmul.f32 %v855_v26, %v975_v53  ;;  %v639_v23 = vadd.f32 %v625_v17, %v607_v14 }
 0x1e0   :  { %v859_v25 = vpop.eup %858  ;;  %v610_v24 = vmul.f32 %v857_v19, %v975_v53  ;;  %v641_v34 = vadd.f32 %v625_v17, %v609_v16 }
 0x1e1   :  { %v861_v31 = vpop.eup %860  ;;  %v640_v32 = vadd.f32 %v625_v17, %v608_v20  ;;  %v655_v33 = vmul.f32 %v851_v2, %v639_v23  ;;  %v611_v35 = vmul.f32 %v859_v25, %v969_v13 }
 0x1e2   :  { %v863_v36 = vpop.eup %862  ;;  %v642_v37 = vadd.f32 %v625_v17, %v610_v24  ;;  %v657_v9 = vmul.f32 %v853_v58, %v641_v34  ;;  %v613_v47 = vmul.f32 %v861_v31, %v969_v13 }
 0x1e3   :  { %v865_v41 = vpop.eup %864  ;;  %v656_v49 = vmul.f32 %v855_v26, %v640_v32  ;;  %v671_v53 = vadd.f32 %v655_v33, %v1045_v38  ;;  %v612_v10 = vmul.f32 %v863_v36, %v969_v13  ;;  %v643_v52 = vadd.f32 %v629_v45, %v611_v35 }
 0x1e4   :  { %v867_v59 = vpop.eup %866  ;;  %v658_v50 = vmul.f32 %v857_v19, %v642_v37  ;;  %v673_v63 = vadd.f32 %v657_v9, %v1049_v42  ;;  %v614_v55 = vmul.f32 %v865_v41, %v969_v13  ;;  %v645_v60 = vadd.f32 %v629_v45, %v613_v47 }
 0x1e5   :  { %v869_v3 = vpop.eup %868  ;;  %v672_v0 = vadd.f32 %v656_v49, %v1047_v39  ;;  %687 = vst [vmem:[%s1173_s4] sm:$0xff] %v671_v53  ;;  %v644_v2 = vadd.f32 %v629_v45, %v612_v10  ;;  %v659_v38 = vmul.f32 %v859_v25, %v643_v52  ;;  %v615_v6 = vmul.f32 %v867_v59, %v971_v18 }
 0x1e6   :  { %v871_v7 = vpop.eup %870  ;;  %v674_v12 = vadd.f32 %v658_v50, %v1051_v44  ;;  %689 = vst [vmem:[%s1173_s4 + $0x10] sm:$0xff] %v673_v63  ;;  %v646_v13 = vadd.f32 %v629_v45, %v614_v55  ;;  %v661_v42 = vmul.f32 %v861_v31, %v645_v60  ;;  %v617_v58 = vmul.f32 %v869_v3, %v971_v18 }
 0x1e7   :  { %v873_v39 = vpop.eup %872  ;;  %688 = vst [vmem:[%s1173_s4 + $0x8] sm:$0xff] %v672_v0  ;;  %v660_v14 = vmul.f32 %v863_v36, %v644_v2  ;;  %v675_v15 = vadd.f32 %v659_v38, %v579_v27  ;;  %v616_v21 = vmul.f32 %v871_v7, %v971_v18  ;;  %v647_v26 = vadd.f32 %v633_v61, %v615_v6 }
 0x1e8   :  { %v875_v16 = vpop.eup %874  ;;  %690 = vst [vmem:[%s1173_s4 + $0x18] sm:$0xff] %v674_v12  ;;  %v662_v44 = vmul.f32 %v865_v41, %v646_v13  ;;  %v677_v40 = vadd.f32 %v661_v42, %v581_v48  ;;  %v618_v43 = vmul.f32 %v873_v39, %v971_v18  ;;  %v649_v17 = vadd.f32 %v633_v61, %v617_v58  ;;  %v637_v18 = vpop.permute.xlu1 %636 }
 0x1e9   :  { %v877_v19 = vpop.eup %876  ;;  %v676_v20 = vadd.f32 %v660_v14, %v580_v28  ;;  %691 = vst [vmem:[%s1173_s4 + $0x20] sm:$0xff] %v675_v15  ;;  %v648_v23 = vadd.f32 %v633_v61, %v616_v21  ;;  %v663_v25 = vmul.f32 %v867_v59, %v647_v26  ;;  %v619_v24 = vmul.f32 %v875_v16, %v981_v1 }
 0x1ea   :  { %v879_v27 = vpop.eup %878  ;;  %v678_v34 = vadd.f32 %v662_v44, %v582_v46  ;;  %693 = vst [vmem:[%s1173_s4 + $0x30] sm:$0xff] %v677_v40  ;;  %v650_v45 = vadd.f32 %v633_v61, %v618_v43  ;;  %v665_v31 = vmul.f32 %v869_v3, %v649_v17  ;;  %v621_v48 = vmul.f32 %v877_v19, %v981_v1 }
 0x1eb   :  { %v881_v28 = vpop.eup %880  ;;  %692 = vst [vmem:[%s1173_s4 + $0x28] sm:$0xff] %v676_v20  ;;  %v664_v32 = vmul.f32 %v871_v7, %v648_v23  ;;  %v679_v33 = vadd.f32 %v663_v25, %v1053_v54  ;;  %v620_v35 = vmul.f32 %v879_v27, %v981_v1  ;;  %v651_v36 = vadd.f32 %v637_v18, %v619_v24 }
 0x1ec   :  { %694 = vst [vmem:[%s1173_s4 + $0x38] sm:$0xff] %v678_v34  ;;  %v666_v46 = vmul.f32 %v873_v39, %v650_v45  ;;  %v681_v37 = vadd.f32 %v665_v31, %v1057_v51  ;;  %v622_v9 = vmul.f32 %v881_v28, %v981_v1  ;;  %v653_v47 = vadd.f32 %v637_v18, %v621_v48 }
 0x1ed   :  { %v587_v41 = vadd.f32 %v1062_v56, %v1026_v4  ;;  %v680_v49 = vadd.f32 %v664_v32, %v1055_v57  ;;  %695 = vst [vmem:[%s1173_s4 + $0x40] sm:$0xff] %v679_v33  ;;  %v652_v54 = vadd.f32 %v637_v18, %v620_v35  ;;  %v667_v53 = vmul.f32 %v875_v16, %v651_v36 }
 0x1ee   :  { %v589_v10 = vadd.f32 %v1087_v22, %v1032_v8  ;;  %v682_v52 = vadd.f32 %v666_v46, %v1059_v62  ;;  %697 = vst [vmem:[%s1173_s4 + $0x50] sm:$0xff] %v681_v37  ;;  %v654_v1 = vadd.f32 %v637_v18, %v622_v9  ;;  %v669_v51 = vmul.f32 %v877_v19, %v653_v47 }
 0x1ef   :  { %v588_v4 = vadd.f32 %v1065_v29, %v1029_v5  ;;  %696 = vst [vmem:[%s1173_s4 + $0x48] sm:$0xff] %v680_v49  ;;  %v668_v57 = vmul.f32 %v879_v27, %v652_v54  ;;  %v683_v56 = vadd.f32 %v667_v53, %v587_v41  ;;  %v590_v8 = vadd.f32 %v1090_v30, %v1035_v11 }
 0x1f0   :  { %698 = vst [vmem:[%s1173_s4 + $0x58] sm:$0xff] %v682_v52  ;;  %v670_v62 = vmul.f32 %v881_v28, %v654_v1  ;;  %v685_v22 = vadd.f32 %v669_v51, %v589_v10 }
 0x1f1   :  { %v684_v59 = vadd.f32 %v668_v57, %v588_v4  ;;  %699 = vst [vmem:[%s1173_s4 + $0x60] sm:$0xff] %v683_v56 }
 0x1f2   :  { %v686_v5 = vadd.f32 %v670_v62, %v590_v8  ;;  %701 = vst [vmem:[%s1173_s4 + $0x70] sm:$0xff] %v685_v22 }
 0x1f3   :  { %700 = vst [vmem:[%s1173_s4 + $0x68] sm:$0xff] %v684_v59 }
 0x1f4   :  { %702 = vst [vmem:[%s1173_s4 + $0x78] sm:$0xff] %v686_v5 }

</bundles_post_ra>
